<compile_context>
chip_gen: v5e
topology: v5e:2x2
jax: 0.10.0
libtpu: 0.0.40
codegen_flags: <defaults>
</compile_context>

<pallas_src>
import functools

import jax
import jax.numpy as jnp
from jax.experimental import pallas as pl
from jax.experimental.pallas import tpu as pltpu

STATE_SIZE = 6    # HIVPatient observation dim
ACTION_SIZE = 4   # HIVPatient action space
HIDDEN = 24

TB_DEFAULT = 16384  # batch tile (lane width); multiple of 128, ~1.3 MiB VMEM double-buffered


def _round_up(v, m):
    return ((v + m - 1) // m) * m


def _tile_plan(batch, tb_req):
    """Static (Python-level) tile sizing: multiple-of-128 tile, >=2 grid steps
    when possible, tiles evened out to minimise tail padding."""
    b_128 = _round_up(max(batch, 1), 128)
    # Force a multiple of 128, clamp to the 128-padded batch.
    tb = max(128, (int(tb_req) // 128) * 128)
    tb = min(tb, b_128)
    # Keep >=2 grid steps when the batch allows: shards across both v7x
    # TensorCores and enables DMA/compute overlap.  No-op when b_128 == 128.
    if b_128 >= 256:
        tb = min(tb, _round_up(b_128 // 2, 128))
    n_steps = -(-b_128 // tb)                       # cdiv
    tb = _round_up(-(-b_128 // n_steps), 128)       # even out tiles across steps
    b_pad = n_steps * tb
    return tb, n_steps, b_pad


def qnet_kernel(x_ref, w1_ref, b1_ref, w2_ref, b2_ref, w3_ref, b3_ref, out_ref):
    # Lane-dense layout: features on sublanes, batch on the 128-wide lane axis.
    x = x_ref[...]                                                      # (6,  TB) f32
    h1 = jnp.dot(w1_ref[...], x, preferred_element_type=jnp.float32)    # (24, TB)
    h1 = jnp.maximum(h1 + b1_ref[...], 0.0)
    h2 = jnp.dot(w2_ref[...], h1, preferred_element_type=jnp.float32)   # (24, TB)
    h2 = jnp.maximum(h2 + b2_ref[...], 0.0)
    out = jnp.dot(w3_ref[...], h2, preferred_element_type=jnp.float32)  # (4,  TB)
    out_ref[...] = (out + b3_ref[...]).astype(out_ref.dtype)


def _forward_fm(x_t, params, tb_req):
    """Feature-major core: x_t (STATE_SIZE, B) f32 -> (ACTION_SIZE, B) f32."""
    assert x_t.shape[0] == STATE_SIZE
    B = x_t.shape[1]
    w1, b1 = params["w1"], params["b1"]
    w2, b2 = params["w2"], params["b2"]
    w3, b3 = params["w3"], params["b3"]

    tb, n_steps, b_pad = _tile_plan(B, tb_req)

    # Pad the ragged tail only when needed (B is static at trace time).
    if b_pad != B:
        x_t = jnp.pad(x_t, ((0, 0), (0, b_pad - B)))

    # Constant index_map => block never changes => DMA'd once, VMEM-resident.
    const2d = lambda arr: pl.BlockSpec(arr.shape, lambda i: (0, 0))

    out_t = pl.pallas_call(
        qnet_kernel,
        out_shape=jax.ShapeDtypeStruct((ACTION_SIZE, b_pad), jnp.float32),
        grid_spec=pltpu.PrefetchScalarGridSpec(
            num_scalar_prefetch=0,
            grid=(n_steps,),
            in_specs=[
                pl.BlockSpec((STATE_SIZE, tb), lambda i: (0, i)),        # x tile
                const2d(w1), const2d(b1),
                const2d(w2), const2d(b2),
                const2d(w3), const2d(b3),
            ],
            out_specs=pl.BlockSpec((ACTION_SIZE, tb), lambda i: (0, i)),
        ),
        compiler_params=pltpu.CompilerParams(
            dimension_semantics=("parallel",),                            # v7x megacore
        ),
    )(x_t, w1, b1, w2, b2, w3, b3)

    if b_pad != B:
        out_t = out_t[:, :B]
    return out_t


@functools.partial(jax.jit, static_argnames=("tb",))
def qnetwork_baseline(x, params, tb=TB_DEFAULT):
    """Module-spec entry point: x (B, STATE_SIZE) -> (B, ACTION_SIZE).

    The single cast+transpose (+tail pad) in and transpose out are the only
    non-kernel copies; prefer qnetwork_baseline_fm if the producer/consumer
    can stay feature-major."""
    assert x.shape[1] == STATE_SIZE
    x_t = x.astype(jnp.float32).T                                         # (6, B)
    return _forward_fm(x_t, params, tb).T                                 # (B, 4)


@functools.partial(jax.jit, static_argnames=("tb",))
def qnetwork_baseline_fm(x_t, params, tb=TB_DEFAULT):
    """Feature-major entry point: x_t (STATE_SIZE, B) -> (ACTION_SIZE, B).
    Zero wrapper-side transposes; use when the pipeline is feature-major."""
    return _forward_fm(x_t.astype(jnp.float32), params, tb)


def init_params(key):
    """nn.Linear default init, PyTorch layout: W (out,in), b (out,1)."""
    def linear(k, fan_in, fan_out):
        kw, kb = jax.random.split(k)
        bound = 1.0 / jnp.sqrt(jnp.float32(fan_in))
        w = jax.random.uniform(kw, (fan_out, fan_in), jnp.float32, -bound, bound)
        b = jax.random.uniform(kb, (fan_out, 1), jnp.float32, -bound, bound)
        return w, b

    k1, k2, k3 = jax.random.split(key, 3)
    w1, b1 = linear(k1, STATE_SIZE, HIDDEN)
    w2, b2 = linear(k2, HIDDEN, HIDDEN)
    w3, b3 = linear(k3, HIDDEN, ACTION_SIZE)
    return {"w1": w1, "b1": b1, "w2": w2, "b2": b2, "w3": w3, "b3": b3}


def reference_forward(x, params):
    h1 = jnp.maximum(x @ params["w1"].T + params["b1"][:, 0], 0.0)
    h2 = jnp.maximum(h1 @ params["w2"].T + params["b2"][:, 0], 0.0)
    return h2 @ params["w3"].T + params["b3"][:, 0]


if __name__ == "__main__":
    key = jax.random.PRNGKey(0)
    kp, kx = jax.random.split(key)
    params = init_params(kp)

    # Primary small check (single 128-wide tile, batch-major module semantics).
    batch = 8
    x = jax.random.normal(kx, (batch, STATE_SIZE), jnp.float32)
    out = jax.block_until_ready(qnetwork_baseline(x, params))
    ref = reference_forward(x, params)
    assert out.shape == (batch, ACTION_SIZE)
    assert jnp.allclose(out, ref, atol=1e-4, rtol=1e-4)

    # Multi-tile grid + ragged tail + non-128-multiple user tb (gets rounded).
    batch2 = 300
    x2 = jax.random.normal(jax.random.PRNGKey(1), (batch2, STATE_SIZE), jnp.float32)
    out2 = jax.block_until_ready(qnetwork_baseline(x2, params, tb=200))
    ref2 = reference_forward(x2, params)
    assert out2.shape == (batch2, ACTION_SIZE)
    assert jnp.allclose(out2, ref2, atol=1e-4, rtol=1e-4)

    # Larger batch with default tile plan (>=2 grid steps) via the
    # feature-major path (no wrapper transposes).
    batch3 = 4096
    x3 = jax.random.normal(jax.random.PRNGKey(2), (batch3, STATE_SIZE), jnp.float32)
    out3_t = jax.block_until_ready(qnetwork_baseline_fm(x3.T, params))
    ref3 = reference_forward(x3, params)
    assert out3_t.shape == (ACTION_SIZE, batch3)
    assert jnp.allclose(out3_t.T, ref3, atol=1e-4, rtol=1e-4)

    print("KERNEL_OK")
</pallas_src>

<mosaic_0001>
module attributes {stable_mosaic.version = 11 : i64} {
  func.func @qnet_kernel(%arg0: i32, %arg1: memref<6x128xf32, #tpu.memory_space<vmem>>, %arg2: memref<24x6xf32, #tpu.memory_space<vmem>>, %arg3: memref<24x1xf32, #tpu.memory_space<vmem>>, %arg4: memref<24x24xf32, #tpu.memory_space<vmem>>, %arg5: memref<24x1xf32, #tpu.memory_space<vmem>>, %arg6: memref<4x24xf32, #tpu.memory_space<vmem>>, %arg7: memref<4x1xf32, #tpu.memory_space<vmem>>, %arg8: memref<4x128xf32, #tpu.memory_space<vmem>>) attributes {dimension_semantics = [#tpu.dimension_semantics<parallel>], iteration_bounds = array<i64: 1>, scalar_prefetch = 0 : i64, scratch_operands = 0 : i64, tpu.core_type = #tpu.core_type<tc>, window_params = [{transform_indices = @transform_0, window_bounds = array<i64: 6, 128>}, {pipeline_mode = #tpu.pipeline_mode<synchronous>, transform_indices = @transform_1, window_bounds = array<i64: 24, 6>}, {pipeline_mode = #tpu.pipeline_mode<synchronous>, transform_indices = @transform_2, window_bounds = array<i64: 24, 1>}, {pipeline_mode = #tpu.pipeline_mode<synchronous>, transform_indices = @transform_3, window_bounds = array<i64: 24, 24>}, {pipeline_mode = #tpu.pipeline_mode<synchronous>, transform_indices = @transform_4, window_bounds = array<i64: 24, 1>}, {pipeline_mode = #tpu.pipeline_mode<synchronous>, transform_indices = @transform_5, window_bounds = array<i64: 4, 24>}, {pipeline_mode = #tpu.pipeline_mode<synchronous>, transform_indices = @transform_6, window_bounds = array<i64: 4, 1>}, {transform_indices = @transform_7, window_bounds = array<i64: 4, 128>}]} {
    %c0 = arith.constant 0 : index
    %c0_0 = arith.constant 0 : index
    %0 = vector.load %arg1[%c0, %c0_0] : memref<6x128xf32, #tpu.memory_space<vmem>>, vector<6x128xf32>
    %c0_1 = arith.constant 0 : index
    %c0_2 = arith.constant 0 : index
    %1 = vector.load %arg2[%c0_1, %c0_2] : memref<24x6xf32, #tpu.memory_space<vmem>>, vector<24x6xf32>
    %cst = arith.constant dense<0.000000e+00> : vector<24x128xf32>
    %2 = tpu.matmul %1, %0, %cst {dimension_numbers = #tpu.dot_dimension_numbers<[1], [0], [0], [1], [0, 0, 1, 1], [], []>} : vector<24x6xf32>, vector<6x128xf32>, vector<24x128xf32> -> vector<24x128xf32>
    %c0_3 = arith.constant 0 : index
    %c0_4 = arith.constant 0 : index
    %3 = vector.load %arg3[%c0_3, %c0_4] : memref<24x1xf32, #tpu.memory_space<vmem>>, vector<24x1xf32>
    %4 = vector.broadcast %3 : vector<24x1xf32> to vector<24x128xf32>
    %5 = arith.addf %2, %4 : vector<24x128xf32>
    %cst_5 = arith.constant 0.000000e+00 : f32
    %6 = vector.broadcast %cst_5 : f32 to vector<24x128xf32>
    %7 = arith.maximumf %5, %6 : vector<24x128xf32>
    %c0_6 = arith.constant 0 : index
    %c0_7 = arith.constant 0 : index
    %8 = vector.load %arg4[%c0_6, %c0_7] : memref<24x24xf32, #tpu.memory_space<vmem>>, vector<24x24xf32>
    %cst_8 = arith.constant dense<0.000000e+00> : vector<24x128xf32>
    %9 = tpu.matmul %8, %7, %cst_8 {dimension_numbers = #tpu.dot_dimension_numbers<[1], [0], [0], [1], [0, 0, 1, 1], [], []>} : vector<24x24xf32>, vector<24x128xf32>, vector<24x128xf32> -> vector<24x128xf32>
    %c0_9 = arith.constant 0 : index
    %c0_10 = arith.constant 0 : index
    %10 = vector.load %arg5[%c0_9, %c0_10] : memref<24x1xf32, #tpu.memory_space<vmem>>, vector<24x1xf32>
    %11 = vector.broadcast %10 : vector<24x1xf32> to vector<24x128xf32>
    %12 = arith.addf %9, %11 : vector<24x128xf32>
    %cst_11 = arith.constant 0.000000e+00 : f32
    %13 = vector.broadcast %cst_11 : f32 to vector<24x128xf32>
    %14 = arith.maximumf %12, %13 : vector<24x128xf32>
    %c0_12 = arith.constant 0 : index
    %c0_13 = arith.constant 0 : index
    %15 = vector.load %arg6[%c0_12, %c0_13] : memref<4x24xf32, #tpu.memory_space<vmem>>, vector<4x24xf32>
    %cst_14 = arith.constant dense<0.000000e+00> : vector<4x128xf32>
    %16 = tpu.matmul %15, %14, %cst_14 {dimension_numbers = #tpu.dot_dimension_numbers<[1], [0], [0], [1], [0, 0, 1, 1], [], []>} : vector<4x24xf32>, vector<24x128xf32>, vector<4x128xf32> -> vector<4x128xf32>
    %c0_15 = arith.constant 0 : index
    %c0_16 = arith.constant 0 : index
    %17 = vector.load %arg7[%c0_15, %c0_16] : memref<4x1xf32, #tpu.memory_space<vmem>>, vector<4x1xf32>
    %18 = vector.broadcast %17 : vector<4x1xf32> to vector<4x128xf32>
    %19 = arith.addf %16, %18 : vector<4x128xf32>
    %c0_17 = arith.constant 0 : index
    %c0_18 = arith.constant 0 : index
    %20 = vector.load %arg8[%c0_17, %c0_18] : memref<4x128xf32, #tpu.memory_space<vmem>>, vector<4x128xf32>
    tpu.vector_store %arg8[%c0_17, %c0_18], %19 {strides = array<i32>} : memref<4x128xf32, #tpu.memory_space<vmem>>, vector<4x128xf32>,
    return
  }
  func.func @transform_0(%arg0: i32) -> (i32, i32) {
    %c0_i32 = arith.constant 0 : i32
    %c0_i32_0 = arith.constant 0 : i32
    return %c0_i32, %arg0 : i32, i32
  }
  func.func @transform_1(%arg0: i32) -> (i32, i32) {
    %c0_i32 = arith.constant 0 : i32
    %c0_i32_0 = arith.constant 0 : i32
    %c0_i32_1 = arith.constant 0 : i32
    return %c0_i32, %c0_i32_0 : i32, i32
  }
  func.func @transform_2(%arg0: i32) -> (i32, i32) {
    %c0_i32 = arith.constant 0 : i32
    %c0_i32_0 = arith.constant 0 : i32
    %c0_i32_1 = arith.constant 0 : i32
    return %c0_i32, %c0_i32_0 : i32, i32
  }
  func.func @transform_3(%arg0: i32) -> (i32, i32) {
    %c0_i32 = arith.constant 0 : i32
    %c0_i32_0 = arith.constant 0 : i32
    %c0_i32_1 = arith.constant 0 : i32
    return %c0_i32, %c0_i32_0 : i32, i32
  }
  func.func @transform_4(%arg0: i32) -> (i32, i32) {
    %c0_i32 = arith.constant 0 : i32
    %c0_i32_0 = arith.constant 0 : i32
    %c0_i32_1 = arith.constant 0 : i32
    return %c0_i32, %c0_i32_0 : i32, i32
  }
  func.func @transform_5(%arg0: i32) -> (i32, i32) {
    %c0_i32 = arith.constant 0 : i32
    %c0_i32_0 = arith.constant 0 : i32
    %c0_i32_1 = arith.constant 0 : i32
    return %c0_i32, %c0_i32_0 : i32, i32
  }
  func.func @transform_6(%arg0: i32) -> (i32, i32) {
    %c0_i32 = arith.constant 0 : i32
    %c0_i32_0 = arith.constant 0 : i32
    %c0_i32_1 = arith.constant 0 : i32
    return %c0_i32, %c0_i32_0 : i32, i32
  }
  func.func @transform_7(%arg0: i32) -> (i32, i32) {
    %c0_i32 = arith.constant 0 : i32
    %c0_i32_0 = arith.constant 0 : i32
    return %c0_i32, %arg0 : i32, i32
  }
}

</mosaic_0001>

<bundles_post_ra>
// kernel: qnetwork_baseline.1
= control target key start
LH: loop header
LB: loop body
LE: loop exit
PB: predicated region body
PF: predicated region fallthrough
CT: control target
= control target key end

     0   :  { %vm58_vm0 = vcmask 1045504   ;;  %vm48_vm1 = vcmask 48128   ;;  %v202_v0 = vmov 0   ;;  %vm112_vm2 = vcmask 195584   ;;  %s298_s2 = inlined_call_operand.vmem [shape: f32[24,1], index: 2, kind: input, shape index: {}]   ;;  %s299_s0 = inlined_call_operand.vmem [shape: f32[6,128], index: 0, kind: input, shape index: {}]   ;;  %s300_s1 = inlined_call_operand.vmem [shape: f32[24,6], index: 1, kind: input, shape index: {}]   ;;  %s301_s4 = inlined_call_operand.vmem [shape: f32[24,1], index: 4, kind: input, shape index: {}]   ;;  %s302_s6 = inlined_call_operand.vmem [shape: f32[4,1], index: 6, kind: input, shape index: {}]   ;;  %s303_s3 = inlined_call_operand.vmem [shape: f32[24,24], index: 3, kind: input, shape index: {}]   ;;  %s304_s5 = inlined_call_operand.vmem [shape: f32[4,24], index: 5, kind: input, shape index: {}]   ;;  %s305_s7 = inlined_call_operand.vmem [shape: f32[4,128], index: 7, kind: output, shape index: {}]  }
   0x1   :  { %199 = vset.pattern.permute.xlu0 %v202_v0  ;;  %v32_v1 = vld [vmem:[%s298_s2 + $0x10] sm:$0xff]  ;;  %v26_v2 = vld [vmem:[%s299_s0] sm:$0x3f]  ;;  %200 = vset.pattern.permute.xlu1 %v202_v0  ;;  %v31_v6 = vld [vmem:[%s298_s2 + $0x8] sm:$0xff] }
   0x2   :  { %v27_v3 = vld [vmem:[%s300_s1] sm:$0xff]  ;;  %45 = vperm.xlu0 %199, %v32_v1   ;;  %186 = vmatpush.msk.msra.mxu0 %vm58_vm0, %v26_v2  ;;  %v29_v4 = vld [vmem:[%s300_s1 + $0x10] sm:$0xff]  ;;  %v28_v7 = vld [vmem:[%s300_s1 + $0x8] sm:$0xff] }
   0x3   :  { %194 = vmatpush.msk.msra.mxu1 %vm58_vm0, %v26_v2  ;;  %187 = vmatmul.msk.f32.vlgmr.msra.gmra.mxu0 %vm48_vm1, %v27_v3  ;;  %v30_v5 = vld [vmem:[%s298_s2] sm:$0xff]  ;;  %v96_v8 = vld [vmem:[%s301_s4 + $0x10] sm:$0xff]  ;;  %v95_v10 = vld [vmem:[%s301_s4 + $0x8] sm:$0xff] }
   0x4   :  { %189 = vmatmul.msk.f32.vlgmr.msra.gmra.mxu1 %vm48_vm1, %v29_v4  ;;  %35 = vperm.xlu1 %200, %v30_v5   ;;  %v152_v9 = vld [vmem:[%s302_s6] sm:$0xf]  ;;  %v92_v24 = vld [vmem:[%s303_s3 + $0x8] sm:$0xff]  ;;  %v93_v26 = vld [vmem:[%s303_s3 + $0x10] sm:$0xff] }
   0x5   :  { %201 = vset.pattern.permute.xlu2 %v202_v0  ;;  %v94_v12 = vld [vmem:[%s301_s4] sm:$0xff] }
   0x6   :  { %104 = vperm.xlu2 %201, %v95_v10   ;;  %v91_v25 = vld [vmem:[%s303_s3] sm:$0xff] }
   0x7   :  { %v151_v39 = vld [vmem:[%s304_s5] sm:$0xf] }
   0xa   :  { %40 = vperm.xlu0 %199, %v31_v6  }
   0xb   :  { %188 = vmatmul.msk.f32.gmra.mxu0 %vm48_vm1, %v28_v7 }
   0xc   :  { %109 = vperm.xlu1 %200, %v96_v8  }
   0xe   :  { %99 = vperm.xlu2 %201, %v94_v12  }
  0x12   :  { %155 = vperm.xlu0 %199, %v152_v9  }
  0x60   :  { %v105_v27 = vpop.permute.xlu2 %104 }
  0x68   :  { %v100_v30 = vpop.permute.xlu2 %99 }
  0x74   :  { %v46_v11 = vpop.permute.xlu0 %45 }
  0x76   :  { %v36_v17 = vpop.permute.xlu1 %35 }
  0x7c   :  { %v41_v18 = vpop.permute.xlu0 %40 }
  0x7e   :  { %v110_v29 = vpop.permute.xlu1 %109 }
  0x80   :  { %v79_v13 = vpop.f32.mrf.mxu0 }
  0x81   :  { %v85_v14 = vpop.f32.mrf.mxu1  ;;  %v80_v20 = vadd.f32 %v79_v13, %v36_v17 }
  0x82   :  { %v86_v15 = vadd.f32 %v85_v14, %v46_v11 }
  0x83   :  { %v88_v23 = vmax.f32 %v80_v20, 0.0 }
  0x84   :  { %v90_v16 = vmax.f32 %v86_v15, 0.0  ;;  %v156_v40 = vpop.permute.xlu0 %155 }
  0x86   :  { %135 = vmatpush.msrb.mxu1 %v90_v16  ;;  %195 = vmatpush.msra.mxu3 %v90_v16 }
  0x88   :  { %v82_v19 = vpop.f32.mrf.mxu0 }
  0x89   :  { %v83_v21 = vadd.f32 %v82_v19, %v41_v18 }
  0x8b   :  { %v89_v22 = vmax.f32 %v83_v21, 0.0 }
  0x8d   :  { %136 = vmatpush.msrb.mxu1 %v89_v22  ;;  %196 = vmatpush.msra.mxu3 %v89_v22 }
  0x8f   :  { %137 = vmatpush.msrb.mxu1 %v88_v23  ;;  %197 = vmatpush.msra.mxu3 %v88_v23 }
  0x90   :  { %191 = vmatmul.msk.f32.vlgmr.msra.gmra.mxu3 %vm112_vm2, %v92_v24  ;;  %190 = vmatmul.msk.f32.vlgmr.msrb.gmra.mxu1 %vm112_vm2, %v91_v25 }
  0x98   :  { %192 = vmatmul.msk.f32.gmra.mxu3 %vm112_vm2, %v93_v26 }
 0x10d   :  { %v139_v31 = vpop.f32.mrf.mxu1 }
 0x10e   :  { %v140_v35 = vadd.f32 %v139_v31, %v100_v30 }
 0x110   :  { %v148_v38 = vmax.f32 %v140_v35, 0.0 }
 0x113   :  { %v142_v28 = vpop.f32.mrf.mxu3 }
 0x114   :  { %v143_v33 = vadd.f32 %v142_v28, %v105_v27 }
 0x116   :  { %v149_v37 = vmax.f32 %v143_v33, 0.0 }
 0x11b   :  { %v145_v32 = vpop.f32.mrf.mxu3 }
 0x11c   :  { %v146_v34 = vadd.f32 %v145_v32, %v110_v29 }
 0x11e   :  { %v150_v36 = vmax.f32 %v146_v34, 0.0 }
 0x120   :  { %174 = vmatpush.msra.mxu2 %v150_v36 }
 0x122   :  { %175 = vmatpush.msra.mxu2 %v149_v37 }
 0x124   :  { %176 = vmatpush.msra.mxu2 %v148_v38 }
 0x125   :  { %193 = vmatmul.msk.f32.vlgmr.msra.gmra.mxu2 %vm112_vm2, %v151_v39 }
 0x1a8   :  { %v178_v41 = vpop.f32.mrf.mxu2 }
 0x1a9   :  { %v179_v42 = vadd.f32 %v178_v41, %v156_v40 }
 0x1ab   :  { %181 = vst [vmem:[%s305_s7] sm:$0xf] %v179_v42 }

</bundles_post_ra>
